<compile_context>
chip_gen: v7x
topology: tpu7x:2x2x1
jax: 0.10.0
libtpu: 0.0.40
codegen_flags: <defaults>
</compile_context>

<pallas_src>
import math
import numpy as np
import jax
import jax.numpy as jnp
from jax.experimental import pallas as pl
from jax.experimental.pallas import tpu as pltpu


def _tile_pos_kernel(src_ref, x_ref, emb_ref, out_ref):
    """src_ref: (B, T) int32 in SMEM; x_ref/out_ref: (T, S_chunk, W);
    emb_ref: (T*T + 1, 1, W) VMEM-resident table (last row is zeros)."""
    b = pl.program_id(0)
    T = x_ref.shape[0]
    for t in range(T):                       # T is small & static -> unrolled
        row = emb_ref[src_ref[b, t]]         # (1, W) gathered from resident table
        out_ref[t] = x_ref[t] + row          # broadcast add over the seq axis


def _choose_s_chunk(S, T, W, itemsize, max_block_bytes=6 << 20):
    """Largest sublane-aligned divisor of S whose (T, chunk, W) slab stays under
    max_block_bytes; full S when the whole slab is already small."""
    if T * S * W * itemsize <= max_block_bytes:
        return S
    sub_mult = {4: 8, 2: 16, 1: 32}.get(itemsize, 8)
    for c in range(S, 0, -1):
        if S % c == 0 and c % sub_mult == 0 and T * c * W * itemsize <= max_block_bytes:
            return c
    return S  # fall back to the full (always legal) axis


def tile_position_embedding(x, ar, embedding, gate=None):
    """x: (B, T, S, W); ar: (B, 2) int32 [w, h]; embedding: (T, T, 1, W);
    gate: (1,) or None (None == ungated)."""
    B, T, S, W = x.shape
    assert embedding.shape == (T, T, 1, W)
    # TODO(synk): the `num_tiles > self.num_tiles` dynamic-resize path of the
    # PyTorch forward (TilePositionEmbedding._dynamic_resize) is not implemented.

    itemsize = x.dtype.itemsize

    # ---- wrapper side (tiny, off the hot path) --------------------------------
    # Flatten the embedding, fold tanh(gate) in, and append a zero row so that
    # invalid (t >= w*h) tiles gather zeros -- no masking inside the kernel.
    emb_flat = embedding.reshape(T * T, 1, W)
    if gate is not None:
        emb_flat = emb_flat * jnp.tanh(gate.astype(jnp.float32)).reshape(1, 1, 1)
    emb_table = jnp.concatenate(
        [emb_flat, jnp.zeros((1, 1, W), emb_flat.dtype)], axis=0).astype(x.dtype)

    # Per-(batch, tile) flat gather index into emb_table (scalar prefetch, SMEM).
    ar = ar.astype(jnp.int32)
    w_b, h_b = ar[:, 0:1], ar[:, 1:2]                      # (B, 1)
    t_idx = jnp.arange(T, dtype=jnp.int32)[None, :]        # (1, T)
    valid = t_idx < w_b * h_b
    h_safe = jnp.maximum(h_b, 1)
    src = jnp.where(valid, (t_idx // h_safe) * T + (t_idx % h_safe),
                    jnp.int32(T * T)).astype(jnp.int32)    # (B, T)

    # ---- tiling ---------------------------------------------------------------
    s_chunk = _choose_s_chunk(S, T, W, itemsize)
    n_s = S // s_chunk

    block_bytes = T * s_chunk * W * itemsize
    emb_pad_bytes = (T * T + 1) * 8 * (-(-W // 128) * 128) * itemsize
    vmem_need = 4 * block_bytes + 2 * emb_pad_bytes + (4 << 20)
    vmem_limit = int(min(max(vmem_need, 32 << 20), 48 << 20))  # v7x-safe headroom

    grid_spec = pltpu.PrefetchScalarGridSpec(
        num_scalar_prefetch=1,
        grid=(B, n_s),
        in_specs=[
            # x: one (T, s_chunk, W) slab per step; batch dim squeezed from view.
            pl.BlockSpec((None, T, s_chunk, W), lambda b, s, src: (b, 0, s, 0)),
            # embedding table: whole thing resident (constant index -> no re-DMA).
            pl.BlockSpec((T * T + 1, 1, W), lambda b, s, src: (0, 0, 0)),
        ],
        out_specs=pl.BlockSpec((None, T, s_chunk, W), lambda b, s, src: (b, 0, s, 0)),
    )

    return pl.pallas_call(
        _tile_pos_kernel,
        grid_spec=grid_spec,
        out_shape=jax.ShapeDtypeStruct(x.shape, x.dtype),
        compiler_params=pltpu.CompilerParams(
            dimension_semantics=("parallel", "parallel"),
            vmem_limit_bytes=vmem_limit),
    )(src, x, emb_table)


def _reference(x, ar, embedding, gate=None):
    """Pure-numpy mirror of the PyTorch forward, for verification."""
    x = np.asarray(x)
    ar = np.asarray(ar)
    embedding = np.asarray(embedding)
    B, T, S, W = x.shape
    out_pe = np.zeros((B, T, 1, W), dtype=x.dtype)
    for b in range(B):
        w, h = int(ar[b, 0]), int(ar[b, 1])
        out_pe[b, : w * h] = embedding[:w, :h].reshape(w * h, 1, W)
    if gate is not None:
        out_pe = out_pe * np.tanh(np.asarray(gate))
    return x + out_pe


if __name__ == "__main__":
    key = jax.random.PRNGKey(0)
    k_emb, k_gate, k_x = jax.random.split(key, 3)

    # Module config (kept small): num_tiles=4, width=128, gated=True.
    num_tiles, width, gated = 4, 128, True
    B, S = 2, 8

    # Deterministic in-script parameter init (matches __init__ shapes).
    embedding = (jax.random.normal(k_emb, (num_tiles, num_tiles, 1, width),
                                   dtype=jnp.float32) / math.sqrt(width))
    gate = jax.random.normal(k_gate, (1,), dtype=jnp.float32) if gated else None

    # Inputs: x (B, num_tiles, seq, width); ar = aspect ratios (w, h) per batch.
    x = jax.random.normal(k_x, (B, num_tiles, S, width), dtype=jnp.float32)
    ar = jnp.array([[2, 2], [1, 3]], dtype=jnp.int32)   # w*h <= num_tiles

    out = jax.block_until_ready(tile_position_embedding(x, ar, embedding, gate))

    expected = _reference(x, ar, embedding, gate)
    np.testing.assert_allclose(np.asarray(out), expected, rtol=1e-6, atol=1e-6)

    print("KERNEL_OK")
</pallas_src>

<mosaic_0001>
module attributes {stable_mosaic.version = 11 : i64} {
  func.func @_tile_pos_kernel(%arg0: i32, %arg1: i32, %arg2: memref<2x4xi32, #tpu.memory_space<smem>>, %arg3: memref<1x4x8x128xf32, #tpu.memory_space<vmem>>, %arg4: memref<17x1x128xf32, #tpu.memory_space<vmem>>, %arg5: memref<1x4x8x128xf32, #tpu.memory_space<vmem>>) attributes {dimension_semantics = [#tpu.dimension_semantics<parallel>, #tpu.dimension_semantics<parallel>], iteration_bounds = array<i64: 2, 1>, scalar_prefetch = 1 : i64, scratch_operands = 0 : i64, tpu.core_type = #tpu.core_type<tc>, window_params = [{transform_indices = @transform_0, window_bounds = array<i64: 1, 4, 8, 128>}, {pipeline_mode = #tpu.pipeline_mode<synchronous>, transform_indices = @transform_1, window_bounds = array<i64: 17, 1, 128>}, {transform_indices = @transform_2, window_bounds = array<i64: 1, 4, 8, 128>}]} {
    %0 = arith.index_cast %arg0 : i32 to index
    %c0 = arith.constant 0 : index
    %1 = memref.load %arg2[%0, %c0] : memref<2x4xi32, #tpu.memory_space<smem>>
    %2 = arith.index_cast %1 : i32 to index
    %c0_0 = arith.constant 0 : index
    %c0_1 = arith.constant 0 : index
    %3 = vector.load %arg4[%2, %c0_0, %c0_1] : memref<17x1x128xf32, #tpu.memory_space<vmem>>, vector<1x1x128xf32>
    %4 = vector.shape_cast %3 : vector<1x1x128xf32> to vector<1x128xf32>
    %c0_2 = arith.constant 0 : index
    %c0_3 = arith.constant 0 : index
    %c0_4 = arith.constant 0 : index
    %c0_5 = arith.constant 0 : index
    %5 = vector.load %arg3[%c0_2, %c0_3, %c0_4, %c0_5] : memref<1x4x8x128xf32, #tpu.memory_space<vmem>>, vector<1x1x8x128xf32>
    %6 = vector.shape_cast %5 : vector<1x1x8x128xf32> to vector<8x128xf32>
    %7 = vector.broadcast %4 : vector<1x128xf32> to vector<8x128xf32>
    %8 = arith.addf %6, %7 : vector<8x128xf32>
    %c0_6 = arith.constant 0 : index
    %c0_7 = arith.constant 0 : index
    %c0_8 = arith.constant 0 : index
    %c0_9 = arith.constant 0 : index
    %9 = vector.load %arg5[%c0_6, %c0_7, %c0_8, %c0_9] : memref<1x4x8x128xf32, #tpu.memory_space<vmem>>, vector<1x1x8x128xf32>
    %10 = vector.shape_cast %9 : vector<1x1x8x128xf32> to vector<8x128xf32>
    %11 = vector.shape_cast %8 : vector<8x128xf32> to vector<1x1x8x128xf32>
    tpu.vector_store %arg5[%c0_6, %c0_7, %c0_8, %c0_9], %11 {strides = array<i32>} : memref<1x4x8x128xf32, #tpu.memory_space<vmem>>, vector<1x1x8x128xf32>,
    %12 = arith.index_cast %arg0 : i32 to index
    %c1 = arith.constant 1 : index
    %13 = memref.load %arg2[%12, %c1] : memref<2x4xi32, #tpu.memory_space<smem>>
    %14 = arith.index_cast %13 : i32 to index
    %c0_10 = arith.constant 0 : index
    %c0_11 = arith.constant 0 : index
    %15 = vector.load %arg4[%14, %c0_10, %c0_11] : memref<17x1x128xf32, #tpu.memory_space<vmem>>, vector<1x1x128xf32>
    %16 = vector.shape_cast %15 : vector<1x1x128xf32> to vector<1x128xf32>
    %c0_12 = arith.constant 0 : index
    %c1_13 = arith.constant 1 : index
    %c0_14 = arith.constant 0 : index
    %c0_15 = arith.constant 0 : index
    %17 = vector.load %arg3[%c0_12, %c1_13, %c0_14, %c0_15] : memref<1x4x8x128xf32, #tpu.memory_space<vmem>>, vector<1x1x8x128xf32>
    %18 = vector.shape_cast %17 : vector<1x1x8x128xf32> to vector<8x128xf32>
    %19 = vector.broadcast %16 : vector<1x128xf32> to vector<8x128xf32>
    %20 = arith.addf %18, %19 : vector<8x128xf32>
    %c0_16 = arith.constant 0 : index
    %c1_17 = arith.constant 1 : index
    %c0_18 = arith.constant 0 : index
    %c0_19 = arith.constant 0 : index
    %21 = vector.load %arg5[%c0_16, %c1_17, %c0_18, %c0_19] : memref<1x4x8x128xf32, #tpu.memory_space<vmem>>, vector<1x1x8x128xf32>
    %22 = vector.shape_cast %21 : vector<1x1x8x128xf32> to vector<8x128xf32>
    %23 = vector.shape_cast %20 : vector<8x128xf32> to vector<1x1x8x128xf32>
    tpu.vector_store %arg5[%c0_16, %c1_17, %c0_18, %c0_19], %23 {strides = array<i32>} : memref<1x4x8x128xf32, #tpu.memory_space<vmem>>, vector<1x1x8x128xf32>,
    %24 = arith.index_cast %arg0 : i32 to index
    %c2 = arith.constant 2 : index
    %25 = memref.load %arg2[%24, %c2] : memref<2x4xi32, #tpu.memory_space<smem>>
    %26 = arith.index_cast %25 : i32 to index
    %c0_20 = arith.constant 0 : index
    %c0_21 = arith.constant 0 : index
    %27 = vector.load %arg4[%26, %c0_20, %c0_21] : memref<17x1x128xf32, #tpu.memory_space<vmem>>, vector<1x1x128xf32>
    %28 = vector.shape_cast %27 : vector<1x1x128xf32> to vector<1x128xf32>
    %c0_22 = arith.constant 0 : index
    %c2_23 = arith.constant 2 : index
    %c0_24 = arith.constant 0 : index
    %c0_25 = arith.constant 0 : index
    %29 = vector.load %arg3[%c0_22, %c2_23, %c0_24, %c0_25] : memref<1x4x8x128xf32, #tpu.memory_space<vmem>>, vector<1x1x8x128xf32>
    %30 = vector.shape_cast %29 : vector<1x1x8x128xf32> to vector<8x128xf32>
    %31 = vector.broadcast %28 : vector<1x128xf32> to vector<8x128xf32>
    %32 = arith.addf %30, %31 : vector<8x128xf32>
    %c0_26 = arith.constant 0 : index
    %c2_27 = arith.constant 2 : index
    %c0_28 = arith.constant 0 : index
    %c0_29 = arith.constant 0 : index
    %33 = vector.load %arg5[%c0_26, %c2_27, %c0_28, %c0_29] : memref<1x4x8x128xf32, #tpu.memory_space<vmem>>, vector<1x1x8x128xf32>
    %34 = vector.shape_cast %33 : vector<1x1x8x128xf32> to vector<8x128xf32>
    %35 = vector.shape_cast %32 : vector<8x128xf32> to vector<1x1x8x128xf32>
    tpu.vector_store %arg5[%c0_26, %c2_27, %c0_28, %c0_29], %35 {strides = array<i32>} : memref<1x4x8x128xf32, #tpu.memory_space<vmem>>, vector<1x1x8x128xf32>,
    %36 = arith.index_cast %arg0 : i32 to index
    %c3 = arith.constant 3 : index
    %37 = memref.load %arg2[%36, %c3] : memref<2x4xi32, #tpu.memory_space<smem>>
    %38 = arith.index_cast %37 : i32 to index
    %c0_30 = arith.constant 0 : index
    %c0_31 = arith.constant 0 : index
    %39 = vector.load %arg4[%38, %c0_30, %c0_31] : memref<17x1x128xf32, #tpu.memory_space<vmem>>, vector<1x1x128xf32>
    %40 = vector.shape_cast %39 : vector<1x1x128xf32> to vector<1x128xf32>
    %c0_32 = arith.constant 0 : index
    %c3_33 = arith.constant 3 : index
    %c0_34 = arith.constant 0 : index
    %c0_35 = arith.constant 0 : index
    %41 = vector.load %arg3[%c0_32, %c3_33, %c0_34, %c0_35] : memref<1x4x8x128xf32, #tpu.memory_space<vmem>>, vector<1x1x8x128xf32>
    %42 = vector.shape_cast %41 : vector<1x1x8x128xf32> to vector<8x128xf32>
    %43 = vector.broadcast %40 : vector<1x128xf32> to vector<8x128xf32>
    %44 = arith.addf %42, %43 : vector<8x128xf32>
    %c0_36 = arith.constant 0 : index
    %c3_37 = arith.constant 3 : index
    %c0_38 = arith.constant 0 : index
    %c0_39 = arith.constant 0 : index
    %45 = vector.load %arg5[%c0_36, %c3_37, %c0_38, %c0_39] : memref<1x4x8x128xf32, #tpu.memory_space<vmem>>, vector<1x1x8x128xf32>
    %46 = vector.shape_cast %45 : vector<1x1x8x128xf32> to vector<8x128xf32>
    %47 = vector.shape_cast %44 : vector<8x128xf32> to vector<1x1x8x128xf32>
    tpu.vector_store %arg5[%c0_36, %c3_37, %c0_38, %c0_39], %47 {strides = array<i32>} : memref<1x4x8x128xf32, #tpu.memory_space<vmem>>, vector<1x1x8x128xf32>,
    return
  }
  func.func @transform_0(%arg0: i32, %arg1: i32, %arg2: memref<2x4xi32, #tpu.memory_space<smem>>) -> (i32, i32, i32, i32) {
    %c0_i32 = arith.constant 0 : i32
    %c0_i32_0 = arith.constant 0 : i32
    %c0_i32_1 = arith.constant 0 : i32
    return %arg0, %c0_i32, %arg1, %c0_i32_0 : i32, i32, i32, i32
  }
  func.func @transform_1(%arg0: i32, %arg1: i32, %arg2: memref<2x4xi32, #tpu.memory_space<smem>>) -> (i32, i32, i32) {
    %c0_i32 = arith.constant 0 : i32
    %c0_i32_0 = arith.constant 0 : i32
    %c0_i32_1 = arith.constant 0 : i32
    %c0_i32_2 = arith.constant 0 : i32
    return %c0_i32, %c0_i32_0, %c0_i32_1 : i32, i32, i32
  }
  func.func @transform_2(%arg0: i32, %arg1: i32, %arg2: memref<2x4xi32, #tpu.memory_space<smem>>) -> (i32, i32, i32, i32) {
    %c0_i32 = arith.constant 0 : i32
    %c0_i32_0 = arith.constant 0 : i32
    %c0_i32_1 = arith.constant 0 : i32
    return %arg0, %c0_i32, %arg1, %c0_i32_0 : i32, i32, i32, i32
  }
}

</mosaic_0001>

<bundles_post_ra>
// kernel: tpu_custom_call.1
= control target key start
LH: loop header
LB: loop body
LE: loop exit
PB: predicated region body
PF: predicated region fallthrough
CT: control target
= control target key end

     0   :  { %s901_s0 = inlined_call_operand.hbm [shape: s32[2,4], index: 0, kind: input, shape index: {}]   ;;  %s902_s1 = inlined_call_operand.hbm [shape: f32[2,4,8,128], index: 1, kind: input, shape index: {}]   ;;  %s903_s2 = inlined_call_operand.hbm [shape: f32[17,1,128], index: 2, kind: input, shape index: {}]   ;;  %s904_s3 = inlined_call_operand.hbm [shape: f32[2,4,8,128], index: 3, kind: output, shape index: {}]  }
   0x1   :  { %s481_s14 = scalar_lea.hbm %s901_s0, 32 }
   0x2   :  { %p482_p0 = scmp.ne.s32.totalorder %s901_s0, %s481_s14  ;;  %p485_p1 = scmp.lt.u32.totalorder %s481_s14, %s901_s0 }
   0x4   :  { %p487_p2 = pnand %p485_p1, %p482_p0 }
   0x6   :  { %490 = shalt.err (!%p487_p2)  }
   0x7   :  { %s639_s19 = smov [#allocation3]  }
   0x8   :  { %9 = dma.hbm_to_smem %s901_s0, 32, %s639_s19, [#allocation2] }
   0x9   :  { %601 = dma.done.wait [#allocation2], 32 }
   0xa   :  { %602 = vsyncadd [#allocation2], 4294967264 }
   0xb   :  { %11 = sfence }
   0xc   :  { %12 = vsyncpa [#allocation5], 0 }
   0xd   :  { %14 = vsyncpa [#allocation5 + $0x1], 0 }
   0xe   :  { %15 = vsyncpa [#allocation8], 0 }
   0xf   :  { %16 = vsyncpa [#allocation6], 0 }
  0x10   :  { %18 = vsyncpa [#allocation6 + $0x1], 0  ;;  %s681_s22 = smov 0   ;;  %s683_s23 = smov 0  }
  0x11   :  { %s685_s24 = smov 0   ;;  %s687_s25 = smov 0  }
  0x12   :  { %s689_s26 = smov 0   ;;  %s691_s27 = smov 0  }
  0x13 LB: > { %s371_s0 = sadd.s32 4294967295, %s637_s27   ;;  %s372_s28 = sadd.s32 4294967294, %s637_s27   ;;  %s637_s27 = sphi %s691_s27, %s24_s27   ;;  %s633_s26 = sphi %s689_s26, %s928_s26   ;;  %s629_s25 = sphi %s687_s25, %s927_s25   ;;  %s625_s24 = sphi %s685_s24, %s926_s24   ;;  %s621_s23 = sphi %s683_s23, %s925_s23   ;;  %s617_s22 = sphi %s681_s22, %s924_s22  }
  0x14   : > { %p58_p3 = scmp.ne.s32.totalorder %s621_s23, %s617_s22  ;;  %p715_p4 = scmp.eq.s32.totalorder %s371_s0, 0 }
  0x15   : > { %p719_p5 = scmp.eq.s32.totalorder %s371_s0, 1  ;;  %p111_p6 = scmp.eq.s32.totalorder %s372_s28, 1 }
  0x16   : > { %s909_s29 = scalar_select %p715_p4, 1, 0 }
  0x17   : > { %s910_s30 = scalar_select %p719_p5, 1, 0 }
  0x18   : > { %p725_p7 = por %p715_p4, %p58_p3  ;;  %p373_p8 = scmp.ge.s32.totalorder %s637_s27, 1 }
  0x19   : > { %p730_p9 = por %p111_p6, %p58_p3  ;;  %p118_p10 = scmp.lt.s32.totalorder %s637_s27, 3 }
  0x1a   : > { %s911_s4 = scalar_select %p725_p7, 1, 0 }
  0x1b   : > { %s912_s5 = scalar_select %p730_p9, 1, 0 }
  0x1c   : > { %p735_p11 = pnand %p373_p8, %p118_p10  ;;  %s640_s7 = smov [#allocation7]  }
  0x1d   : > { %s130_s8 = sshll.u32 %s640_s7, 4  ;;  %s36_s10 = sadd.s32 1, %s633_s26  ;;  %s131_s8 = int_to_ptr.vmem [resolvable:$true] %s130_s8 }
  0x1e   : > { %s913_s6 = scalar_select %p735_p11, 1, 0 }
  0x1f   : > { %p409_p12 = pneg %p735_p11  ;;  %s491_s13 = scalar_lea.hbm %s903_s2, 272 }
  0x20   : > { %p492_p1 = scmp.ne.s32.totalorder %s903_s2, %s491_s13  ;;  %p498_p8 = scmp.lt.u32.totalorder %s491_s13, %s903_s2 }
  0x21   : > { %p744_p0 = pnand %p409_p12, %p715_p4 }
  0x23   : > { %p493_p2 = pneg %p744_p0 }
  0x25   : > { %p494_p3 = pnand %p493_p2, %p492_p1 }
  0x27   : > { %p495_p6 = pneg %p494_p3 }
  0x29   : > { %p500_p10 = pnand %p498_p8, %p495_p6 }
  0x2b   : > { %503 = shalt.err (!%p500_p10)
}
  0x2c   : > { %s504_s18 = scalar_lea.vmem %s131_s8, 272  ;;  %s511_s19 = scalar_lea.vmem %s131_s8, 288 }
  0x2d   : > { %p505_p12 = scmp.ne.s32.totalorder %s131_s8, %s504_s18  ;;  %p512_p4 = scmp.lt.s32.totalorder %s131_s8, %s131_s8 }
  0x2e   : > { %p513_p7 = scmp.lt.s32.totalorder %s511_s19, %s504_s18 }
  0x2f   : > { %p507_p13 = pnand %p505_p12, %p493_p2 }
  0x30   : > { %p514_p11 = por %p513_p7, %p512_p4 }
  0x31   : > { %p508_p9 = pneg %p507_p13 }
  0x33   : > { %p515_p5 = pnand %p514_p11, %p508_p9 }
  0x35   : > { %518 = shalt.err (!%p515_p5)
}
  0x36   : > { %s641_s20 = smov 16   ;;  %s642_s21 = smov 1  }
  0x37   : > { %412 = dma.hbm_to_vmem [thread:$0]  (!%p744_p0), %s903_s2, 272, %s131_s8, [#allocation8], %s641_s20, %s641_s20, %s642_s21  }
  0x38   : > { %p38_p4 = scmp.ge.s32.totalorder %s36_s10, 2  ;;  %s45_s7 = sadd.s32 1, %s625_s24 }
  0x39   : > { %p52_p5 = scmp.ne.s32.totalorder %s625_s24, %s621_s23  ;;  %p53_p7 = scmp.eq.s32.totalorder %s637_s27, 0 }
  0x3a   : > { %s930_s10 = smov (%p38_p4, %s36_s10), 0  ;;  %p916_p11 = scmp.ne.s32.totalorder %s910_s30, 0 }
  0x3b   : > { %p771_p9 = por %p53_p7, %p52_p5  ;;  %s40_s9 = ssub.s32 %s633_s26, %s930_s10 }
  0x3c   : > { %p777_p13 = por %p916_p11, %p52_p5  ;;  %p422_p1 = scmp.lt.s32.totalorder %s637_s27, 2 }
  0x3d   : > { %p43_p0 = scmp.eq.s32.totalorder %s40_s9, 0  ;;  %s144_s8 = sand.u32 1, %s625_s24  }
  0x3e   : > { %s376_s13 = sshll.u32 %s144_s8, 5  ;;  %s399_s15 = sshll.u32 %s633_s26, 9 }
  0x3f   : > { %s786_s14 = scalar_select %p43_p0, %s625_s24, %s45_s7  }
  0x40   : > { %s792_s18 = scalar_lea.hbm %s902_s1, %s399_s15  ;;  %s148_s30 = scalar_lea.vmem [#allocation4], %s376_s13 }
  0x41   : > { %s156_s19 = sshll.u32 %s148_s30, 4  ;;  %p798_p2 = pnand %p422_p1, %p771_p9  ;;  %s794_s19 = int_to_ptr.vmem [resolvable:$true] %s156_s19 }
  0x42   : > { %s802_s21 = scalar_lea.sflag [#allocation5], %s144_s8  ;;  %s519_s0 = scalar_lea.hbm %s792_s18, 512 }
  0x43   : > { %p520_p3 = scmp.ne.s32.totalorder %s792_s18, %s519_s0  ;;  %p521_p6 = pneg %p798_p2 }
  0x44   : > { %s524_s11 = scalar_lea.hbm %s902_s1, 1024  ;;  %p525_p12 = scmp.lt.u32.totalorder %s792_s18, %s902_s1 }
  0x45   : > { %p522_p8 = pnand %p521_p6, %p520_p3  ;;  %p526_p4 = scmp.lt.u32.totalorder %s524_s11, %s519_s0 }
  0x46   : > { %p528_p7 = scmp.lt.u32.totalorder %s519_s0, %s792_s18 }
  0x47   : > { %p523_p10 = pneg %p522_p8  ;;  %p527_p5 = por %p526_p4, %p525_p12 }
  0x49   : > { %p529_p9 = por %p528_p7, %p527_p5 }
  0x4b   : > { %p530_p11 = pnand %p529_p9, %p523_p10 }
  0x4d   : > { %533 = shalt.err (!%p530_p11)
}
  0x4e   : > { %s534_s8 = scalar_lea.vmem %s794_s19, 512  ;;  %s643_s15 = smov [#allocation4]  }
  0x4f   : > { %p535_p1 = scmp.ne.s32.totalorder %s794_s19, %s534_s8  ;;  %s539_s16 = sshll.u32 %s643_s15, 4  ;;  %s540_s16 = int_to_ptr.vmem [resolvable:$false] %s539_s16 }
  0x50   : > { %s541_s17 = scalar_lea.vmem %s540_s16, 1024  ;;  %p542_p8 = scmp.lt.s32.totalorder %s794_s19, %s540_s16 }
  0x51   : > { %p537_p0 = pnand %p535_p1, %p521_p6  ;;  %p543_p12 = scmp.lt.s32.totalorder %s541_s17, %s534_s8 }
  0x53   : > { %p538_p3 = pneg %p537_p0  ;;  %p544_p4 = por %p543_p12, %p542_p8 }
  0x55   : > { %p545_p5 = pnand %p544_p4, %p538_p3 }
  0x57   : > { %548 = shalt.err (!%p545_p5)
}
  0x58   : > { %s644_s30 = smov 128   ;;  %s645_s0 = smov 8  }
  0x59   : > { %416 = dma.hbm_to_vmem [thread:$0]  (!%p798_p2), %s792_s18, 512, %s794_s19, %s802_s21, %s644_s30, %s644_s30, %s645_s0  }
  0x5a   : > { %p919_p6 = scmp.ne.s32.totalorder %s913_s6, 0 }
  0x5b   : > { %s833_s28 = sand.u32 (!%p919_p6), 1, %s621_s23   ;;  %p920_p10 = scmp.ne.s32.totalorder (!%p919_p6), %s911_s4, 0 }
  0x5c   : > { %168 = sbr.rel (%p919_p6) target bundleno = 135 (0x87), region = 28  ;;  %s380_s7 = sshll.u32 (!%p919_p6), %s833_s28, 5 }
  0x5d   : > { %s171_s11 = scalar_lea.sflag (!%p919_p6), [#allocation5], %s833_s28  ;;  %s174_s9 = scalar_lea.vmem (!%p919_p6), [#allocation4], %s380_s7 }
  0x63   : > { %604 = dma.done.wait (%p920_p10), %s171_s11, 512  }
  0x64   : > { %606 = vsyncadd (%p920_p10), %s171_s11, 4294966784  ;;  %p921_p7 = scmp.ne.s32.totalorder %s909_s29, 0 }
  0x66   : > { %608 = dma.done.wait (%p921_p7), [#allocation8], 272  }
  0x67   : > { %610 = vsyncadd (%p921_p7), [#allocation8], 4294967024  ;;  %s383_s6 = sshll.u32 %s629_s25, 7  ;;  %v203_v0 = vld [vmem:[%s174_s9] sm:$0xff]  ;;  %s198_s4 = scalar_lea.vmem [#allocation9], %s380_s7  ;;  %v385_v2 = vld [vmem:[%s174_s9 + $0x8] sm:$0xff] }
  0x68   : > { %s200_s18 = sld [smem:[#allocation3 + %s383_s6]]  ;;  %s212_s19 = sadd.s32 1, %s383_s6  ;;  %v388_v4 = vld [vmem:[%s174_s9 + $0x10] sm:$0xff]  ;;  %v391_v6 = vld [vmem:[%s174_s9 + $0x18] sm:$0xff] }
  0x69   : > { %s213_s20 = sld [smem:[#allocation3 + %s212_s19]]  ;;  %s227_s21 = sadd.s32 2, %s383_s6 }
  0x6a   : > { %s228_s13 = sld [smem:[#allocation3 + %s227_s21]]  ;;  %s242_s8 = sadd.s32 3, %s383_s6 }
  0x6b   : > { %s243_s15 = sld [smem:[#allocation3 + %s242_s8]]  ;;  %s272_s17 = sshll.u32 %s198_s4, 4  ;;  %s847_s17 = int_to_ptr.vmem [resolvable:$true] %s272_s17 }
  0x6c   : > { %s400_s30 = sshll.u32 %s629_s25, 9  ;;  %s258_s25 = scalar_lea.sflag [#allocation6], %s833_s28 }
  0x6d   : > { %s852_s9 = scalar_lea.hbm %s904_s3, %s400_s30  ;;  %s646_s19 = smov [#allocation9]  }
  0x6e   : > { %s201_s16 = scalar_lea.vmem [#allocation7], %s200_s18  ;;  %s549_s18 = scalar_lea.vmem %s847_s17, 512 }
  0x6f   : > { %v384_v1 = vld [vmem:[%s201_s16] ss:$0 sm:$0xff]  ;;  %s214_s29 = scalar_lea.vmem [#allocation7], %s213_s20  ;;  %p550_p2 = scmp.ne.s32.totalorder %s847_s17, %s549_s18 }
  0x70   : > { %v210_v3 = vadd.f32 %v384_v1, %v203_v0  ;;  %v386_v5 = vld [vmem:[%s214_s29] ss:$0 sm:$0xff]  ;;  %s229_s0 = scalar_lea.vmem [#allocation7], %s228_s13  ;;  %s553_s20 = sshll.u32 %s646_s19, 4  ;;  %s554_s20 = int_to_ptr.vmem [resolvable:$false] %s553_s20 }
  0x71   : > { %v224_v7 = vadd.f32 %v386_v5, %v385_v2  ;;  %v389_v8 = vld [vmem:[%s229_s0] ss:$0 sm:$0xff]  ;;  %s244_s7 = scalar_lea.vmem [#allocation7], %s243_s15  ;;  %p551_p9 = pnand %p550_p2, %p777_p13 }
  0x72   : > { %211 = vst [vmem:[%s198_s4] sm:$0xff] %v210_v3  ;;  %v239_v9 = vadd.f32 %v389_v8, %v388_v4  ;;  %v392_v10 = vld [vmem:[%s244_s7] ss:$0 sm:$0xff]  ;;  %s555_s21 = scalar_lea.vmem %s554_s20, 1024  ;;  %p556_p1 = scmp.lt.s32.totalorder %s847_s17, %s554_s20 }
  0x73   : > { %387 = vst [vmem:[%s198_s4 + $0x8] sm:$0xff] %v224_v7  ;;  %v254_v11 = vadd.f32 %v392_v10, %v391_v6  ;;  %p552_p11 = pneg %p551_p9  ;;  %p557_p0 = scmp.lt.s32.totalorder %s555_s21, %s549_s18 }
  0x74   : > { %390 = vst [vmem:[%s198_s4 + $0x10] sm:$0xff] %v239_v9 }
  0x75   : > { %393 = vst [vmem:[%s198_s4 + $0x18] sm:$0xff] %v254_v11  ;;  %p558_p3 = por %p557_p0, %p556_p1 }
  0x77   : > { %p559_p8 = pnand %p558_p3, %p552_p11 }
  0x79   : > { %562 = shalt.err (!%p559_p8)
}
  0x7a   : > { %s563_s13 = scalar_lea.hbm %s852_s9, 512  ;;  %s567_s16 = scalar_lea.hbm %s904_s3, 1024 }
  0x7b   : > { %p564_p12 = scmp.ne.s32.totalorder %s852_s9, %s563_s13  ;;  %p568_p6 = scmp.lt.u32.totalorder %s852_s9, %s904_s3 }
  0x7c   : > { %p569_p10 = scmp.lt.u32.totalorder %s567_s16, %s563_s13  ;;  %p571_p2 = scmp.lt.u32.totalorder %s563_s13, %s852_s9 }
  0x7d   : > { %p565_p4 = pnand %p564_p12, %p777_p13 }
  0x7e   : > { %p570_p7 = por %p569_p10, %p568_p6 }
  0x7f   : > { %p566_p5 = pneg %p565_p4 }
  0x80   : > { %p572_p9 = por %p571_p2, %p570_p7 }
  0x82   : > { %p573_p11 = pnand %p572_p9, %p566_p5 }
  0x84   : > { %576 = shalt.err (!%p573_p11)
}
  0x85   : > { %s647_s30 = smov 128   ;;  %s648_s0 = smov 8  }
  0x86   : > { %407 = dma.vmem_to_hbm [thread:$0]  (%p777_p13), %s847_s17, 512, %s852_s9, %s258_s25, %s647_s30, %s647_s30, %s648_s0  }
  0x87 PF: > { %s287_s7 = sand.u32 1, %s617_s22   ;;  %p922_p1 = scmp.ne.s32.totalorder %s912_s5, 0 }
  0x88   : > { %p923_p0 = scmp.ge.s32.totalorder %s637_s27, 2  ;;  %s288_s11 = scalar_lea.sflag [#allocation6], %s287_s7 }
  0x8a   : > { %p418_p3 = pnand %p923_p0, %p922_p1 }
  0x8c   : > { %612 = dma.done.wait (!%p418_p3), %s288_s11, 512  }
  0x8d   : > { %614 = vsyncadd (!%p418_p3), %s288_s11, 4294966784  ;;  %s24_s27 = sadd.s32 1, %s637_s27   ;;  %s924_s22 = smov %s621_s23 }
  0x8e   : > { %p21_p8 = scmp.ge.s32.totalorder %s24_s27, 4   ;;  %s925_s23 = smov %s625_s24 }
  0x8f   : > { %s926_s24 = smov %s786_s14  ;;  %s927_s25 = smov %s633_s26 }
  0x90   : > { %s928_s26 = smov %s930_s10  ;;  %23 = sbr.rel (!%p21_p8) target bundleno = 19 (0x13), region = 87 }
  0x97   :  { %293 = vsyncpa [#allocation5], 1 }
  0x98   :  { %295 = vsyncpa [#allocation5 + $0x1], 1 }
  0x99   :  { %296 = vsyncpa [#allocation8], 1 }
  0x9a   :  { %297 = vsyncpa [#allocation6], 1 }
  0x9b   :  { %299 = vsyncpa [#allocation6 + $0x1], 1 }

</bundles_post_ra>
